<compile_context>
chip_gen: v6e
topology: v6e:2x2x1
jax: 0.10.0
libtpu: 0.0.40
codegen_flags: <defaults>
</compile_context>

<pallas_src>
import functools

import numpy as np
import jax
import jax.numpy as jnp
from jax.experimental import pallas as pl
from jax.experimental.pallas import tpu as pltpu

LANE = 128


def _round_up(x, m):
    return (x + m - 1) // m * m


# ---------------------------------------------------------------------------
# Pallas kernel: full forward pass, 4 bf16 MXU matmuls with f32 accumulation.
# ---------------------------------------------------------------------------
def cnn_kernel(x_ref, m1_ref, b1_ref, wrest_ref, out_ref):
    # conv1(stride 2) + bias + ReLU + MaxPool1d(2): one 256-wide matmul; even
    # pooled positions in lanes [0,128), odd in [128,256).  b1_ref also puts a
    # constant 1.0 in lanes 127/255 so a1[:,127] == 1 (bias lane for later layers).
    y1 = jnp.dot(x_ref[...], m1_ref[...],
                 preferred_element_type=jnp.float32) + b1_ref[...]
    a1 = jnp.maximum(jnp.maximum(y1[:, :LANE], 0.0),
                     jnp.maximum(y1[:, LANE:], 0.0))                 # (bm, 128) f32
    a1 = a1.astype(jnp.bfloat16)

    # conv2(stride 2) + ReLU + MaxPool1d(2); bias folded via constant-1 lane 127.
    y2 = jnp.dot(a1, wrest_ref[:, 0:2 * LANE],
                 preferred_element_type=jnp.float32)                 # (bm, 256)
    a2 = jnp.maximum(jnp.maximum(y2[:, :LANE], 0.0),
                     jnp.maximum(y2[:, LANE:], 0.0)).astype(jnp.bfloat16)

    # fc1 + ReLU (bias folded; lane 127 stays the constant 1).
    h = jnp.maximum(
        jnp.dot(a2, wrest_ref[:, 2 * LANE:3 * LANE],
                preferred_element_type=jnp.float32), 0.0).astype(jnp.bfloat16)

    # fc2 (real logits in lanes [0, n_classes)).
    out_ref[...] = jnp.dot(h, wrest_ref[:, 3 * LANE:4 * LANE],
                           preferred_element_type=jnp.float32)       # (bm, 128)


# ---------------------------------------------------------------------------
# Host-side packing: Toeplitz-unroll Conv1d+MaxPool1d(2) into even/odd matrices.
# ---------------------------------------------------------------------------
def conv_pool_to_matmul(w, b, L_in, stride):
    """x_flat @ Me gives conv outputs at even pooled positions 2j, Mo at odd
    positions 2j+1, flattened co*L_pool+j.  bias is the matching flat bias."""
    w = np.asarray(w, np.float32)
    b = np.asarray(b, np.float32)
    Cout, Cin, K = w.shape
    L_conv = (L_in - K) // stride + 1
    L_pool = L_conv // 2
    Me = np.zeros((Cin * L_in, Cout * L_pool), np.float32)
    Mo = np.zeros((Cin * L_in, Cout * L_pool), np.float32)
    for co in range(Cout):
        for j in range(L_pool):
            for ci in range(Cin):
                for k in range(K):
                    Me[ci * L_in + stride * (2 * j) + k, co * L_pool + j] = w[co, ci, k]
                    Mo[ci * L_in + stride * (2 * j + 1) + k, co * L_pool + j] = w[co, ci, k]
    bias = np.repeat(b, L_pool).astype(np.float32)
    return Me, Mo, bias


def build_packed_weights(params, Cin, L):
    """Pack all layers into: conv1 slab (Cin*L, 256), conv1 bias row (1, 256),
    and the conv2/fc1/fc2 slab (128, 512) with biases folded via lane 127."""
    (w1, b1, w2, b2, wf1, bf1, wf2, bf2) = params
    wf1 = np.asarray(wf1, np.float32); bf1 = np.asarray(bf1, np.float32)
    wf2 = np.asarray(wf2, np.float32); bf2 = np.asarray(bf2, np.float32)

    M1e, M1o, be1 = conv_pool_to_matmul(w1, b1, L_in=L, stride=2)     # (400, 92)
    K1, N1 = M1e.shape
    L1p = N1 // np.asarray(w1).shape[0]                               # 23
    M2e, M2o, be2 = conv_pool_to_matmul(w2, b2, L_in=L1p, stride=2)   # (92, 20)
    K2, N2 = M2e.shape
    F1_in, F1_out = wf1.shape[1], wf1.shape[0]                        # 20, 10
    F2_in, n_classes = wf2.shape[1], wf2.shape[0]                     # 10, nc

    # Single-slab layout only covers the tiny benchnirs model (loud failure otherwise).
    assert N1 < LANE and K2 < LANE and N2 < LANE - 1
    assert F1_in < LANE and F1_out < LANE - 1 and F2_in < LANE and n_classes < LANE
    assert K1 % 16 == 0  # bf16 sublane packing of the (K1, 256) slab

    # Slab 1: conv1 even|odd, (K1, 256).  Bias lives in a separate (1,256) row;
    # lanes 127/255 of that row carry a constant 1 into a1[:,127].
    M1 = np.zeros((K1, 2 * LANE), np.float32)
    M1[:, :N1] = M1e
    M1[:, LANE:LANE + N1] = M1o
    b1row = np.zeros((1, 2 * LANE), np.float32)
    b1row[0, :N1] = be1
    b1row[0, LANE:LANE + N1] = be1
    b1row[0, LANE - 1] = 1.0
    b1row[0, 2 * LANE - 1] = 1.0

    # Slab 2: [conv2 even|odd (256) | fc1 (128) | fc2 (128)] = (128, 512).
    # Row 127 is the bias row fed by the constant-1 lane of each activation.
    W = np.zeros((LANE, 4 * LANE), np.float32)
    W[:K2, :N2] = M2e
    W[:K2, LANE:LANE + N2] = M2o
    W[LANE - 1, :N2] = be2
    W[LANE - 1, LANE:LANE + N2] = be2
    W[LANE - 1, LANE - 1] = 1.0          # carry constant into a2[:, 127]
    W[LANE - 1, 2 * LANE - 1] = 1.0
    W[:F1_in, 2 * LANE:2 * LANE + F1_out] = wf1.T
    W[LANE - 1, 2 * LANE:2 * LANE + F1_out] = bf1
    W[LANE - 1, 3 * LANE - 1] = 1.0      # carry constant into h[:, 127]
    W[:F2_in, 3 * LANE:3 * LANE + n_classes] = wf2.T
    W[LANE - 1, 3 * LANE:3 * LANE + n_classes] = bf2

    return M1, b1row, W, n_classes


def _pick_bm(B_pad, block_b):
    """Largest multiple-of-16 divisor of B_pad that is <= block_b, preferring
    >= 2 grid steps so both v7x TensorCores are used."""
    cands = [d for d in range(16, B_pad + 1, 16) if B_pad % d == 0]
    multi = [d for d in cands if B_pad // d >= 2]
    pool = multi if multi else cands
    fit = [d for d in pool if d <= block_b]
    return max(fit) if fit else min(pool)


def make_cnn_forward(params, n_channels, length, *, block_b=512):
    """Pack weights once, upload once, return a jitted forward(x) -> logits."""
    M1_np, b1_np, W_np, n_classes = build_packed_weights(params, n_channels, length)
    m1_dev = jnp.asarray(M1_np, jnp.bfloat16)     # resident bf16 weight slabs
    w_dev = jnp.asarray(W_np, jnp.bfloat16)
    b1_dev = jnp.asarray(b1_np, jnp.float32)      # tiny f32 bias row (exact add)
    K1 = M1_np.shape[0]

    def _forward(x):
        B, Cin, L = x.shape
        assert Cin * L == K1
        x_flat = jnp.reshape(x, (B, K1)).astype(jnp.bfloat16)
        B_pad = _round_up(B, 16)
        if B_pad != B:
            x_flat = jnp.pad(x_flat, ((0, B_pad - B), (0, 0)))
        bm = _pick_bm(B_pad, block_b)
        grid = (B_pad // bm,)
        out = pl.pallas_call(
            cnn_kernel,
            out_shape=jax.ShapeDtypeStruct((B_pad, LANE), jnp.float32),
            grid=grid,
            in_specs=[
                pl.BlockSpec((bm, K1), lambda i: (i, 0)),             # x tile
                pl.BlockSpec((K1, 2 * LANE), lambda i: (0, 0)),       # resident conv1 slab
                pl.BlockSpec((1, 2 * LANE), lambda i: (0, 0)),        # conv1 bias row
                pl.BlockSpec((LANE, 4 * LANE), lambda i: (0, 0)),     # resident conv2/fc slab
            ],
            out_specs=pl.BlockSpec((bm, LANE), lambda i: (i, 0)),
            compiler_params=pltpu.CompilerParams(
                dimension_semantics=("parallel",)),
        )(x_flat, m1_dev, b1_dev, w_dev)
        return out[:B, :n_classes]

    return jax.jit(_forward)


# ---------------------------------------------------------------------------
# Pure-JAX reference (mirrors the PyTorch forward) for a correctness check.
# ---------------------------------------------------------------------------
def reference_forward(x, params):
    (w1, b1, w2, b2, wf1, bf1, wf2, bf2) = params

    def conv1d(x, w, b, stride):
        y = jax.lax.conv_general_dilated(
            x, w, window_strides=(stride,), padding="VALID",
            dimension_numbers=("NCH", "OIH", "NCH"))
        return y + b[None, :, None]

    def maxpool2(x):
        B, C, L = x.shape
        return x[:, :, :(L // 2) * 2].reshape(B, C, L // 2, 2).max(-1)

    y = jax.nn.relu(conv1d(x, w1, b1, 2))
    y = maxpool2(y)
    y = jax.nn.relu(conv1d(y, w2, b2, 2))
    y = maxpool2(y)
    y = y.reshape(x.shape[0], -1)
    y = jax.nn.relu(y @ wf1.T + bf1)
    return y @ wf2.T + bf2


if __name__ == "__main__":
    n_classes = 3
    Cin, L = 4, 100   # L=100 -> conv1:46 -> pool:23 -> conv2:10 -> pool:5 -> flat:20

    key = jax.random.PRNGKey(0)
    ks = jax.random.split(key, 10)
    params = (
        0.1 * jax.random.normal(ks[0], (4, 4, 10), jnp.float32),       # conv1.weight
        0.1 * jax.random.normal(ks[1], (4,), jnp.float32),             # conv1.bias
        0.1 * jax.random.normal(ks[2], (4, 4, 5), jnp.float32),        # conv2.weight
        0.1 * jax.random.normal(ks[3], (4,), jnp.float32),             # conv2.bias
        0.1 * jax.random.normal(ks[4], (10, 20), jnp.float32),         # fc1.weight
        0.1 * jax.random.normal(ks[5], (10,), jnp.float32),            # fc1.bias
        0.1 * jax.random.normal(ks[6], (n_classes, 10), jnp.float32),  # fc2.weight
        0.1 * jax.random.normal(ks[7], (n_classes,), jnp.float32),     # fc2.bias
    )

    forward = make_cnn_forward(params, Cin, L)   # pack + upload weights once

    # Small batch (single grid step).
    x_small = jax.random.normal(ks[8], (2, Cin, L), jnp.float32)
    out_small = jax.block_until_ready(forward(x_small))
    ref_small = reference_forward(x_small, params)
    np.testing.assert_allclose(np.asarray(out_small), np.asarray(ref_small),
                               rtol=2e-2, atol=2e-2)

    # Larger batch: exercises padding-to-16 + multi-step "parallel" grid.
    x_big = jax.random.normal(ks[9], (48, Cin, L), jnp.float32)
    out_big = jax.block_until_ready(forward(x_big))
    ref_big = reference_forward(x_big, params)
    np.testing.assert_allclose(np.asarray(out_big), np.asarray(ref_big),
                               rtol=2e-2, atol=2e-2)

    print("KERNEL_OK")
</pallas_src>

<mosaic_0001>
module attributes {stable_mosaic.version = 11 : i64} {
  func.func @cnn_kernel(%arg0: i32, %arg1: memref<16x400xbf16, #tpu.memory_space<vmem>>, %arg2: memref<400x256xbf16, #tpu.memory_space<vmem>>, %arg3: memref<1x256xf32, #tpu.memory_space<vmem>>, %arg4: memref<128x512xbf16, #tpu.memory_space<vmem>>, %arg5: memref<16x128xf32, #tpu.memory_space<vmem>>) attributes {dimension_semantics = [#tpu.dimension_semantics<parallel>], iteration_bounds = array<i64: 1>, scalar_prefetch = 0 : i64, scratch_operands = 0 : i64, tpu.core_type = #tpu.core_type<tc>, window_params = [{transform_indices = @transform_0, window_bounds = array<i64: 16, 400>}, {pipeline_mode = #tpu.pipeline_mode<synchronous>, transform_indices = @transform_1, window_bounds = array<i64: 400, 256>}, {pipeline_mode = #tpu.pipeline_mode<synchronous>, transform_indices = @transform_2, window_bounds = array<i64: 1, 256>}, {pipeline_mode = #tpu.pipeline_mode<synchronous>, transform_indices = @transform_3, window_bounds = array<i64: 128, 512>}, {transform_indices = @transform_4, window_bounds = array<i64: 16, 128>}]} {
    %c0 = arith.constant 0 : index
    %c0_0 = arith.constant 0 : index
    %0 = vector.load %arg1[%c0, %c0_0] : memref<16x400xbf16, #tpu.memory_space<vmem>>, vector<16x400xbf16>
    %c0_1 = arith.constant 0 : index
    %c0_2 = arith.constant 0 : index
    %1 = vector.load %arg2[%c0_1, %c0_2] : memref<400x256xbf16, #tpu.memory_space<vmem>>, vector<400x256xbf16>
    %cst = arith.constant dense<0.000000e+00> : vector<16x256xf32>
    %2 = tpu.matmul %0, %1, %cst {dimension_numbers = #tpu.dot_dimension_numbers<[1], [0], [0], [1], [0, 0, 1, 1], [], []>} : vector<16x400xbf16>, vector<400x256xbf16>, vector<16x256xf32> -> vector<16x256xf32>
    %c0_3 = arith.constant 0 : index
    %c0_4 = arith.constant 0 : index
    %3 = vector.load %arg3[%c0_3, %c0_4] : memref<1x256xf32, #tpu.memory_space<vmem>>, vector<1x256xf32>
    %4 = vector.broadcast %3 : vector<1x256xf32> to vector<16x256xf32>
    %5 = arith.addf %2, %4 : vector<16x256xf32>
    %6 = vector.extract_strided_slice %5 {offsets = [0, 0], sizes = [16, 128], strides = [1, 1]} : vector<16x256xf32> to vector<16x128xf32>
    %cst_5 = arith.constant 0.000000e+00 : f32
    %7 = vector.broadcast %cst_5 : f32 to vector<16x128xf32>
    %8 = arith.maximumf %6, %7 : vector<16x128xf32>
    %9 = vector.extract_strided_slice %5 {offsets = [0, 128], sizes = [16, 128], strides = [1, 1]} : vector<16x256xf32> to vector<16x128xf32>
    %cst_6 = arith.constant 0.000000e+00 : f32
    %10 = vector.broadcast %cst_6 : f32 to vector<16x128xf32>
    %11 = arith.maximumf %9, %10 : vector<16x128xf32>
    %12 = arith.maximumf %8, %11 : vector<16x128xf32>
    %13 = arith.truncf %12 : vector<16x128xf32> to vector<16x128xbf16>
    %c0_7 = arith.constant 0 : index
    %c0_8 = arith.constant 0 : index
    %14 = vector.load %arg4[%c0_7, %c0_8] : memref<128x512xbf16, #tpu.memory_space<vmem>>, vector<128x256xbf16>
    %cst_9 = arith.constant dense<0.000000e+00> : vector<16x256xf32>
    %15 = tpu.matmul %13, %14, %cst_9 {dimension_numbers = #tpu.dot_dimension_numbers<[1], [0], [0], [1], [0, 0, 1, 1], [], []>} : vector<16x128xbf16>, vector<128x256xbf16>, vector<16x256xf32> -> vector<16x256xf32>
    %16 = vector.extract_strided_slice %15 {offsets = [0, 0], sizes = [16, 128], strides = [1, 1]} : vector<16x256xf32> to vector<16x128xf32>
    %cst_10 = arith.constant 0.000000e+00 : f32
    %17 = vector.broadcast %cst_10 : f32 to vector<16x128xf32>
    %18 = arith.maximumf %16, %17 : vector<16x128xf32>
    %19 = vector.extract_strided_slice %15 {offsets = [0, 128], sizes = [16, 128], strides = [1, 1]} : vector<16x256xf32> to vector<16x128xf32>
    %cst_11 = arith.constant 0.000000e+00 : f32
    %20 = vector.broadcast %cst_11 : f32 to vector<16x128xf32>
    %21 = arith.maximumf %19, %20 : vector<16x128xf32>
    %22 = arith.maximumf %18, %21 : vector<16x128xf32>
    %23 = arith.truncf %22 : vector<16x128xf32> to vector<16x128xbf16>
    %c0_12 = arith.constant 0 : index
    %c256 = arith.constant 256 : index
    %24 = vector.load %arg4[%c0_12, %c256] : memref<128x512xbf16, #tpu.memory_space<vmem>>, vector<128x128xbf16>
    %cst_13 = arith.constant dense<0.000000e+00> : vector<16x128xf32>
    %25 = tpu.matmul %23, %24, %cst_13 {dimension_numbers = #tpu.dot_dimension_numbers<[1], [0], [0], [1], [0, 0, 1, 1], [], []>} : vector<16x128xbf16>, vector<128x128xbf16>, vector<16x128xf32> -> vector<16x128xf32>
    %cst_14 = arith.constant 0.000000e+00 : f32
    %26 = vector.broadcast %cst_14 : f32 to vector<16x128xf32>
    %27 = arith.maximumf %25, %26 : vector<16x128xf32>
    %28 = arith.truncf %27 : vector<16x128xf32> to vector<16x128xbf16>
    %c0_15 = arith.constant 0 : index
    %c384 = arith.constant 384 : index
    %29 = vector.load %arg4[%c0_15, %c384] : memref<128x512xbf16, #tpu.memory_space<vmem>>, vector<128x128xbf16>
    %cst_16 = arith.constant dense<0.000000e+00> : vector<16x128xf32>
    %30 = tpu.matmul %28, %29, %cst_16 {dimension_numbers = #tpu.dot_dimension_numbers<[1], [0], [0], [1], [0, 0, 1, 1], [], []>} : vector<16x128xbf16>, vector<128x128xbf16>, vector<16x128xf32> -> vector<16x128xf32>
    %c0_17 = arith.constant 0 : index
    %c0_18 = arith.constant 0 : index
    %31 = vector.load %arg5[%c0_17, %c0_18] : memref<16x128xf32, #tpu.memory_space<vmem>>, vector<16x128xf32>
    tpu.vector_store %arg5[%c0_17, %c0_18], %30 {strides = array<i32>} : memref<16x128xf32, #tpu.memory_space<vmem>>, vector<16x128xf32>,
    return
  }
  func.func @transform_0(%arg0: i32) -> (i32, i32) {
    %c0_i32 = arith.constant 0 : i32
    %c0_i32_0 = arith.constant 0 : i32
    return %arg0, %c0_i32 : i32, i32
  }
  func.func @transform_1(%arg0: i32) -> (i32, i32) {
    %c0_i32 = arith.constant 0 : i32
    %c0_i32_0 = arith.constant 0 : i32
    %c0_i32_1 = arith.constant 0 : i32
    return %c0_i32, %c0_i32_0 : i32, i32
  }
  func.func @transform_2(%arg0: i32) -> (i32, i32) {
    %c0_i32 = arith.constant 0 : i32
    %c0_i32_0 = arith.constant 0 : i32
    %c0_i32_1 = arith.constant 0 : i32
    return %c0_i32, %c0_i32_0 : i32, i32
  }
  func.func @transform_3(%arg0: i32) -> (i32, i32) {
    %c0_i32 = arith.constant 0 : i32
    %c0_i32_0 = arith.constant 0 : i32
    %c0_i32_1 = arith.constant 0 : i32
    return %c0_i32, %c0_i32_0 : i32, i32
  }
  func.func @transform_4(%arg0: i32) -> (i32, i32) {
    %c0_i32 = arith.constant 0 : i32
    %c0_i32_0 = arith.constant 0 : i32
    return %arg0, %c0_i32 : i32, i32
  }
}

</mosaic_0001>

<bundles_post_ra>
// kernel: _forward.1
= control target key start
LH: loop header
LB: loop body
LE: loop exit
PB: predicated region body
PF: predicated region fallthrough
CT: control target
= control target key end

     0   :  { %9 = vsyncpa [#allocation3], 0  ;;  %s1243_s0 = inlined_call_operand.vmem [shape: bf16[16,400], index: 0, kind: input, shape index: {}]   ;;  %s1244_s1 = inlined_call_operand.hbm [shape: bf16[400,256], index: 1, kind: input, shape index: {}]   ;;  %s1245_s2 = inlined_call_operand.vmem [shape: f32[1,256], index: 2, kind: input, shape index: {}]   ;;  %s1246_s3 = inlined_call_operand.hbm [shape: bf16[128,512], index: 3, kind: input, shape index: {}]   ;;  %s1247_s4 = inlined_call_operand.vmem [shape: f32[16,128], index: 4, kind: output, shape index: {}]  }
   0x1   :  { %10 = vsyncpa [#allocation5], 0  ;;  %s1164_s15 = smov [#allocation2]  }
   0x2   :  { %s18_s16 = sshll.u32 %s1164_s15, 4  ;;  %s19_s16 = int_to_ptr.vmem [resolvable:$true] %s18_s16 }
   0x3   :  { %s1128_s17 = scalar_lea.vmem %s19_s16, 6400  ;;  %p1133_p1 = scmp.lt.s32.totalorder %s19_s16, %s19_s16 }
   0x4   :  { %p1129_p0 = scmp.ne.s32.totalorder %s19_s16, %s1128_s17  ;;  %p1134_p2 = scmp.lt.s32.totalorder %s1128_s17, %s1128_s17 }
   0x6   :  { %p1135_p3 = por %p1134_p2, %p1133_p1 }
   0x8   :  { %p1136_p4 = pnand %p1135_p3, %p1129_p0 }
   0xa   :  { %1139 = shalt.err (!%p1136_p4)
}
   0xb   :  { %s1165_s18 = smov 128   ;;  %s1166_s19 = smov 8  }
   0xc   :  { %24 = dma.hbm_to_vmem [thread:$0]  %s1244_s1, 6400, %s19_s16, [#allocation3], %s1165_s18, %s1165_s18, %s1166_s19  }
   0xd   :  { %s1167_s22 = smov [#allocation4]  }
   0xe   :  { %s32_s23 = sshll.u32 %s1167_s22, 4  ;;  %s33_s23 = int_to_ptr.vmem [resolvable:$true] %s32_s23 }
   0xf   :  { %s1148_s24 = scalar_lea.vmem %s33_s23, 4096  ;;  %p1153_p6 = scmp.lt.s32.totalorder %s33_s23, %s33_s23 }
  0x10   :  { %p1149_p5 = scmp.ne.s32.totalorder %s33_s23, %s1148_s24  ;;  %p1154_p7 = scmp.lt.s32.totalorder %s1148_s24, %s1148_s24 }
  0x12   :  { %p1155_p8 = por %p1154_p7, %p1153_p6 }
  0x14   :  { %p1156_p9 = pnand %p1155_p8, %p1149_p5 }
  0x16   :  { %1159 = shalt.err (!%p1156_p9)
}
  0x17   :  { %s1168_s25 = smov 256   ;;  %s1169_s26 = smov 16  }
  0x18   :  { %38 = dma.hbm_to_vmem [thread:$0]  %s1246_s3, 4096, %s33_s23, [#allocation5], %s1168_s25, %s1168_s25, %s1169_s26  }
  0x19   :  { %1160 = dma.done.wait [#allocation3], 6400  }
  0x1a   :  { %1161 = vsyncadd [#allocation3], 4294960896 }
  0x1b   :  { %1162 = dma.done.wait [#allocation5], 4096  }
  0x1c   :  { %1163 = vsyncadd [#allocation5], 4294963200  ;;  %v999_v0 = vld [vmem:[#allocation2 + $0x74] ss:$8 sps:$4 sm:$0xff]   ;;  %v1001_v1 = vld [vmem:[#allocation2 + $0x70] ss:$8 sps:$4 sm:$0xff]  }
  0x1d   :  { %385 = vmatprep.subr.bf16.mxu0 %v999_v0  ;;  %v1002_v2 = vld [vmem:[#allocation2 + $0x64] ss:$8 sps:$4 sm:$0xff]   ;;  %v1004_v3 = vld [vmem:[#allocation2 + $0x60] ss:$8 sps:$4 sm:$0xff]   ;;  %v1005_v4 = vld [vmem:[#allocation2 + $0x54] ss:$8 sps:$4 sm:$0xff]  }
  0x1e   :  { %386 = vmatpush1.bf16.msra.mxu0 %v1001_v1  ;;  %v1007_v5 = vld [vmem:[#allocation2 + $0x50] ss:$8 sps:$4 sm:$0xff]   ;;  %v1008_v6 = vld [vmem:[#allocation2 + $0x44] ss:$8 sps:$4 sm:$0xff]   ;;  %v1019_v7 = vld [vmem:[#allocation2 + $0x174] ss:$8 sps:$4 sm:$0xff]  }
  0x1f   :  { %387 = vmatprep.subr.bf16.mxu0 %v1002_v2  ;;  %v1022_v8 = vld [vmem:[#allocation2 + $0x170] ss:$8 sps:$4 sm:$0xff]   ;;  %v1010_v9 = vld [vmem:[#allocation2 + $0x40] ss:$8 sps:$4 sm:$0xff]   ;;  %428 = vmatprep.subr.bf16.mxu1 %v1019_v7  ;;  %v1011_v10 = vld [vmem:[#allocation2 + $0x34] ss:$8 sps:$4 sm:$0xff]  }
  0x20   :  { %429 = vmatpush1.bf16.msra.mxu1 %v1022_v8  ;;  %v1025_v11 = vld [vmem:[#allocation2 + $0x164] ss:$8 sps:$4 sm:$0xff]   ;;  %v1028_v12 = vld [vmem:[#allocation2 + $0x160] ss:$8 sps:$4 sm:$0xff]   ;;  %v1013_v13 = vld [vmem:[#allocation2 + $0x30] ss:$8 sps:$4 sm:$0xff]  }
  0x21   :  { %430 = vmatprep.subr.bf16.mxu1 %v1025_v11  ;;  %v1014_v14 = vld [vmem:[#allocation2 + $0x24] ss:$8 sps:$4 sm:$0xff]   ;;  %v1031_v15 = vld [vmem:[#allocation2 + $0x154] ss:$8 sps:$4 sm:$0xff]   ;;  %v1034_v16 = vld [vmem:[#allocation2 + $0x150] ss:$8 sps:$4 sm:$0xff]  }
  0x22   :  { %388 = vmatpush1.bf16.msra.mxu0 %v1004_v3  ;;  %v1037_v17 = vld [vmem:[#allocation2 + $0x144] ss:$8 sps:$4 sm:$0xff]   ;;  %v1016_v18 = vld [vmem:[#allocation2 + $0x20] ss:$8 sps:$4 sm:$0xff]   ;;  %v1017_v19 = vld [vmem:[#allocation2 + $0x14] ss:$8 sps:$4 sm:$0xff]  }
  0x23   :  { %389 = vmatprep.subr.bf16.mxu0 %v1005_v4  ;;  %v1040_v20 = vld [vmem:[#allocation2 + $0x140] ss:$8 sps:$4 sm:$0xff]   ;;  %v1043_v21 = vld [vmem:[#allocation2 + $0x134] ss:$8 sps:$4 sm:$0xff]   ;;  %v1021_v22 = vld [vmem:[#allocation2 + $0x10] ss:$8 sps:$4 sm:$0xff]  }
  0x24   :  { %431 = vmatpush1.bf16.msra.mxu1 %v1028_v12  ;;  %v1023_v23 = vld [vmem:[#allocation2 + $0x4] ss:$8 sps:$4 sm:$0xff]   ;;  %v1046_v24 = vld [vmem:[#allocation2 + $0x130] ss:$8 sps:$4 sm:$0xff]   ;;  %v1027_v26 = vld [vmem:[#allocation2] ss:$8 sps:$4 sm:$0xff]  }
  0x25   :  { %432 = vmatprep.subr.bf16.mxu1 %v1031_v15  ;;  %v1049_v25 = vld [vmem:[#allocation2 + $0x124] ss:$8 sps:$4 sm:$0xff]   ;;  %v1029_v27 = vld [vmem:[#allocation2 + $0xf4] ss:$8 sps:$4 sm:$0xff]   ;;  %v1052_v28 = vld [vmem:[#allocation2 + $0x120] ss:$8 sps:$4 sm:$0xff]  }
  0x26   :  { %390 = vmatpush1.bf16.msra.mxu0 %v1007_v5  ;;  %v1055_v29 = vld [vmem:[#allocation2 + $0x114] ss:$8 sps:$4 sm:$0xff]   ;;  %v1033_v30 = vld [vmem:[#allocation2 + $0xf0] ss:$8 sps:$4 sm:$0xff]   ;;  %v1035_v31 = vld [vmem:[#allocation2 + $0xe4] ss:$8 sps:$4 sm:$0xff]  }
  0x27   :  { %391 = vmatprep.subr.bf16.mxu0 %v1008_v6  ;;  %v1058_v32 = vld [vmem:[#allocation2 + $0x110] ss:$8 sps:$4 sm:$0xff]   ;;  %v1061_v33 = vld [vmem:[#allocation2 + $0x104] ss:$8 sps:$4 sm:$0xff]   ;;  %vm381_vm0 = vcmask 130048   ;;  %v1170_v6 = vmov 0  }
  0x28   :  { %433 = vmatpush1.bf16.msra.mxu1 %v1034_v16  ;;  %v1073_v34 = vld [vmem:[%s1243_s0 + $0xc] ss:$16 sps:$4 sm:$0xff]   ;;  %v1039_v35 = vld [vmem:[#allocation2 + $0xe0] ss:$8 sps:$4 sm:$0xff]   ;;  %v1079_v37 = vld [vmem:[%s1243_s0 + $0x4] ss:$16 sps:$4 sm:$0xff]  }
  0x29   :  { %434 = vmatprep.subr.bf16.mxu1 %v1037_v17  ;;  %v1041_v36 = vld [vmem:[#allocation2 + $0xd4] ss:$8 sps:$4 sm:$0xff]   ;;  %899 = vmatprep.mubr.msk.bf16.mxu1 %vm381_vm0, %v1073_v34  ;;  %v1064_v38 = vld [vmem:[#allocation2 + $0x100] ss:$8 sps:$4 sm:$0xff]   ;;  %v1067_v39 = vld [vmem:[#allocation2 + $0x184] ss:$8 sps:$4 sm:$0xff]  }
  0x2a   :  { %392 = vmatpush1.bf16.msra.mxu0 %v1010_v9  ;;  %417 = vmatprep.mubr.bf16.mxu0 %v1079_v37  ;;  %v1045_v40 = vld [vmem:[#allocation2 + $0xd0] ss:$8 sps:$4 sm:$0xff]   ;;  %v1047_v41 = vld [vmem:[#allocation2 + $0xc4] ss:$8 sps:$4 sm:$0xff]   ;;  %v1070_v42 = vld [vmem:[#allocation2 + $0x180] ss:$8 sps:$4 sm:$0xff]  }
  0x2b   :  { %393 = vmatprep.subr.bf16.mxu0 %v1011_v10  ;;  %v1082_v43 = vld [vmem:[#allocation4 + $0xe4] ss:$16 sps:$4 sm:$0xff]   ;;  %v1051_v44 = vld [vmem:[#allocation2 + $0xc0] ss:$8 sps:$4 sm:$0xff]   ;;  %v1057_v49 = vld [vmem:[#allocation2 + $0xb0] ss:$8 sps:$4 sm:$0xff]  }
  0x2c   :  { %435 = vmatpush1.bf16.msra.mxu1 %v1040_v20  ;;  %v1071_v45 = vld [vmem:[%s1243_s0 + $0x8] ss:$16 sps:$4 sm:$0xff]   ;;  %v1053_v46 = vld [vmem:[#allocation2 + $0xb4] ss:$8 sps:$4 sm:$0xff]   ;;  %v1080_v47 = vld [vmem:[#allocation4 + $0xe0] ss:$16 sps:$4 sm:$0xff]  }
  0x2d   :  { %436 = vmatprep.subr.bf16.mxu1 %v1043_v21  ;;  %v1085_v48 = vld [vmem:[#allocation4 + $0xc4] ss:$16 sps:$4 sm:$0xff]   ;;  %v1083_v51 = vld [vmem:[#allocation4 + $0xc0] ss:$16 sps:$4 sm:$0xff]   ;;  %v1104_v7 = vld [vmem:[#allocation4 + $0xe8] ss:$16 sps:$4 sm:$0xff]  }
  0x2e   :  { %394 = vmatpush1.bf16.msra.mxu0 %v1013_v13  ;;  %v1059_v50 = vld [vmem:[#allocation2 + $0xa4] ss:$8 sps:$4 sm:$0xff]   ;;  %v1063_v53 = vld [vmem:[#allocation2 + $0xa0] ss:$8 sps:$4 sm:$0xff]   ;;  %v1065_v54 = vld [vmem:[#allocation2 + $0x94] ss:$8 sps:$4 sm:$0xff]   ;;  %v102_v13 = vlaneseq }
  0x2f   :  { %395 = vmatprep.subr.bf16.mxu0 %v1014_v14  ;;  %v1088_v52 = vld [vmem:[#allocation4 + $0xa4] ss:$16 sps:$4 sm:$0xff]   ;;  %v1086_v55 = vld [vmem:[#allocation4 + $0xa0] ss:$16 sps:$4 sm:$0xff]   ;;  %v1171_v8 = vmov 0.0   ;;  %vm1172_vm1 = vmmov 0  }
  0x30   :  { %437 = vmatpush1.bf16.msra.mxu1 %v1046_v24  ;;  %v1069_v56 = vld [vmem:[#allocation2 + $0x90] ss:$8 sps:$4 sm:$0xff]   ;;  %v1074_v57 = vld [vmem:[#allocation2 + $0x84] ss:$8 sps:$4 sm:$0xff]   ;;  %v1076_v58 = vld [vmem:[#allocation2 + $0x80] ss:$8 sps:$4 sm:$0xff]  }
  0x31   :  { %438 = vmatprep.subr.bf16.mxu1 %v1049_v25  ;;  %v1077_v59 = vld [vmem:[%s1243_s0] ss:$16 sps:$4 sm:$0xff]   ;;  %v1091_v61 = vld [vmem:[#allocation4 + $0x84] ss:$16 sps:$4 sm:$0xff]   ;;  %v1105_v9 = vld [vmem:[#allocation4 + $0xc8] ss:$16 sps:$4 sm:$0xff]  }
  0x32   :  { %396 = vmatpush1.bf16.msra.mxu0 %v1016_v18  ;;  %v1089_v60 = vld [vmem:[#allocation4 + $0x80] ss:$16 sps:$4 sm:$0xff]   ;;  %v1094_v62 = vld [vmem:[#allocation4 + $0x64] ss:$16 sps:$4 sm:$0xff]   ;;  %v1106_v10 = vld [vmem:[#allocation4 + $0xa8] ss:$16 sps:$4 sm:$0xff]  }
  0x33   :  { %397 = vmatprep.subr.bf16.mxu0 %v1017_v19  ;;  %v1092_v63 = vld [vmem:[#allocation4 + $0x60] ss:$16 sps:$4 sm:$0xff]   ;;  %v1097_v0 = vld [vmem:[#allocation4 + $0x44] ss:$16 sps:$4 sm:$0xff]   ;;  %v1107_v11 = vld [vmem:[#allocation4 + $0x88] ss:$16 sps:$4 sm:$0xff]  }
  0x34   :  { %439 = vmatpush1.bf16.msra.mxu1 %v1052_v28  ;;  %v1095_v1 = vld [vmem:[#allocation4 + $0x40] ss:$16 sps:$4 sm:$0xff]   ;;  %v1100_v2 = vld [vmem:[#allocation4 + $0x24] ss:$16 sps:$4 sm:$0xff]   ;;  %v1108_v12 = vld [vmem:[#allocation4 + $0x68] ss:$16 sps:$4 sm:$0xff]  }
  0x35   :  { %440 = vmatprep.subr.bf16.mxu1 %v1055_v29  ;;  %v1098_v3 = vld [vmem:[#allocation4 + $0x20] ss:$16 sps:$4 sm:$0xff]   ;;  %v1103_v4 = vld [vmem:[#allocation4 + $0x4] ss:$16 sps:$4 sm:$0xff]   ;;  %v103_v14 = vshrl.u32 %v102_v13, 7 }
  0x36   :  { %398 = vmatpush1.bf16.msra.mxu0 %v1021_v22  ;;  %v1101_v5 = vld [vmem:[#allocation4] ss:$16 sps:$4 sm:$0xff]  }
  0x37   :  { %399 = vmatprep.subr.bf16.mxu0 %v1023_v23  ;;  %v104_v15 = vsub.s32 0, %v103_v14  ;;  %v108_v16 = vsub.s32 1, %v103_v14  ;;  %v100_v18 = vld [vmem:[%s1245_s2] sm:$0x3] }
  0x38   :  { %441 = vmatpush1.bf16.msra.mxu1 %v1058_v32 }
  0x39   :  { %442 = vmatprep.subr.bf16.mxu1 %v1061_v33  ;;  %v105_v19 = vrot.slane %v100_v18, %v104_v15  ;;  %v109_v20 = vrot.slane %v100_v18, %v108_v16 }
  0x3a   :  { %400 = vmatpush1.bf16.msra.mxu0 %v1027_v26 }
  0x3b   :  { %401 = vmatprep.subr.bf16.mxu0 %v1029_v27 }
  0x3c   :  { %443 = vmatpush1.bf16.msra.mxu1 %v1064_v38 }
  0x3d   :  { %458 = vmatprep.subr.bf16.mxu1 %v1067_v39 }
  0x3e   :  { %402 = vmatpush2.bf16.msra.mxu0 %v1033_v30 }
  0x3f   :  { %403 = vmatprep.subr.bf16.mxu0 %v1035_v31 }
  0x40   :  { %459 = vmatpush2.bf16.msra.mxu1 %v1070_v42 }
  0x41   :  { %574 = vmatprep.subr.bf16.mxu1 %v1082_v43  ;;  %v1109_v43 = vld [vmem:[#allocation4 + $0x48] ss:$16 sps:$4 sm:$0xff]  }
  0x42   :  { %404 = vmatpush2.bf16.msra.mxu0 %v1039_v35 }
  0x43   :  { %405 = vmatprep.subr.bf16.mxu0 %v1041_v36  ;;  %461 = vmatmul.mubr.bf16.vlgmr.msra.gmra.mxu1 %v1071_v45  ;;  %v1111_v45 = vld [vmem:[#allocation4 + $0x8] ss:$16 sps:$4 sm:$0xff]  }
  0x44   :  { %575 = vmatpush1.bf16.msra.mxu1 %v1080_v47  ;;  %606 = vmatprep.mubr.bf16.mxu1 %v1170_v6  ;;  %v1113_v47 = vld [vmem:[#allocation4 + $0xcc] ss:$16 sps:$4 sm:$0xff]  }
  0x45   :  { %576 = vmatprep.subr.bf16.mxu1 %v1085_v48  ;;  %v1114_v48 = vld [vmem:[#allocation4 + $0xac] ss:$16 sps:$4 sm:$0xff]  }
  0x46   :  { %406 = vmatpush2.bf16.msra.mxu0 %v1045_v40 }
  0x47   :  { %407 = vmatprep.subr.bf16.mxu0 %v1047_v41 }
  0x48   :  { %577 = vmatpush1.bf16.msra.mxu1 %v1083_v51  ;;  %v1117_v51 = vld [vmem:[#allocation4 + $0x4c] ss:$16 sps:$4 sm:$0xff]  }
  0x49   :  { %578 = vmatprep.subr.bf16.mxu1 %v1088_v52 }
  0x4a   :  { %408 = vmatpush2.bf16.msra.mxu0 %v1051_v44  ;;  %v1110_v44 = vld [vmem:[#allocation4 + $0x28] ss:$16 sps:$4 sm:$0xff]  }
  0x4b   :  { %409 = vmatprep.subr.bf16.mxu0 %v1053_v46  ;;  %v1112_v46 = vld [vmem:[#allocation4 + $0xec] ss:$16 sps:$4 sm:$0xff]  }
  0x4c   :  { %579 = vmatpush1.bf16.msra.mxu1 %v1086_v55 }
  0x4d   :  { %580 = vmatprep.subr.bf16.mxu1 %v1091_v61 }
  0x4e   :  { %410 = vmatpush2.bf16.msra.mxu0 %v1057_v49  ;;  %v1115_v49 = vld [vmem:[#allocation4 + $0x8c] ss:$16 sps:$4 sm:$0xff]  }
  0x4f   :  { %411 = vmatprep.subr.bf16.mxu0 %v1059_v50  ;;  %v1116_v50 = vld [vmem:[#allocation4 + $0x6c] ss:$16 sps:$4 sm:$0xff]  }
  0x50   :  { %581 = vmatpush1.bf16.msra.mxu1 %v1089_v60 }
  0x51   :  { %582 = vmatprep.subr.bf16.mxu1 %v1094_v62 }
  0x52   :  { %412 = vmatpush2.bf16.msra.mxu0 %v1063_v53 }
  0x53   :  { %413 = vmatprep.subr.bf16.mxu0 %v1065_v54 }
  0x54   :  { %583 = vmatpush1.bf16.msra.mxu1 %v1092_v63  ;;  %v1118_v63 = vld [vmem:[#allocation4 + $0x2c] ss:$16 sps:$4 sm:$0xff]  }
  0x55   :  { %584 = vmatprep.subr.bf16.mxu1 %v1097_v0  ;;  %v1119_v0 = vld [vmem:[#allocation4 + $0xc] ss:$16 sps:$4 sm:$0xff]  }
  0x56   :  { %414 = vmatpush2.bf16.msra.mxu0 %v1069_v56 }
  0x57   :  { %415 = vmatprep.subr.bf16.mxu0 %v1074_v57 }
  0x58   :  { %585 = vmatpush1.bf16.msra.mxu1 %v1095_v1 }
  0x59   :  { %586 = vmatprep.subr.bf16.mxu1 %v1100_v2 }
  0x5a   :  { %416 = vmatpush2.bf16.msra.mxu0 %v1076_v58 }
  0x5b   :  { %950 = vmatprep.subr.bf16.mxu0 %v1171_v8 }
  0x5c   :  { %587 = vmatpush1.bf16.msra.mxu1 %v1098_v3 }
  0x5d   :  { %418 = vmatmul.mubr.bf16.vlgmr.msra.gmra.mxu0 %v1077_v59  ;;  %588 = vmatprep.subr.bf16.mxu1 %v1103_v4 }
  0x5e   :  { %951 = vmatpush3.bf16.msra.mxu0 %v1104_v7  ;;  %966 = vmatprep.mubr.msk.bf16.mxu0 %vm1172_vm1, %v1171_v8 }
  0x5f   :  { %952 = vmatprep.subr.bf16.mxu0 %v1171_v8 }
  0x60   :  { %589 = vmatpush1.bf16.msra.mxu1 %v1101_v5 }
  0x61   :  { %970 = vmatprep.subr.bf16.mxu1 %v1171_v8 }
  0x62   :  { %953 = vmatpush3.bf16.msra.mxu0 %v1105_v9 }
  0x63   :  { %954 = vmatprep.subr.bf16.mxu0 %v1171_v8 }
  0x66   :  { %955 = vmatpush3.bf16.msra.mxu0 %v1106_v10 }
  0x67   :  { %956 = vmatprep.subr.bf16.mxu0 %v1171_v8 }
  0x6a   :  { %957 = vmatpush3.bf16.msra.mxu0 %v1107_v11 }
  0x6b   :  { %958 = vmatprep.subr.bf16.mxu0 %v1171_v8 }
  0x6e   :  { %959 = vmatpush3.bf16.msra.mxu0 %v1108_v12 }
  0x6f   :  { %960 = vmatprep.subr.bf16.mxu0 %v1171_v8 }
  0x72   :  { %961 = vmatpush3.bf16.msra.mxu0 %v1109_v43 }
  0x73   :  { %962 = vmatprep.subr.bf16.mxu0 %v1171_v8 }
  0x76   :  { %963 = vmatpush3.bf16.msra.mxu0 %v1110_v44 }
  0x77   :  { %964 = vmatprep.subr.bf16.mxu0 %v1171_v8 }
  0x7a   :  { %965 = vmatpush3.bf16.msra.mxu0 %v1111_v45 }
 0x103   :  { %v462_v17 = vpop.f32.mrf.mxu1 }
 0x105   :  { %v464_v21 = vpop.f32.mrf.mxu1 }
 0x107   :  { %v466_v26 = vpop.f32.mrf.mxu1 }
 0x109   :  { %v468_v34 = vpop.f32.mrf.mxu1 }
 0x11d   :  { %v419_v22 = vpop.f32.mrf.mxu0 }
 0x11e   :  { %v420_v24 = vadd.f32 %v419_v22, %v105_v19 }
 0x11f   :  { %v421_v23 = vpop.f32.mrf.mxu0 }
 0x120   :  { %v422_v25 = vadd.f32 %v421_v23, %v109_v20  ;;  %v463_v31 = vadd.f32 %v462_v17, %v420_v24 }
 0x121   :  { %v423_v27 = vpop.f32.mrf.mxu0 }
 0x122   :  { %v465_v28 = vadd.f32 %v464_v21, %v422_v25  ;;  %v424_v29 = vadd.f32 %v423_v27, %v105_v19  ;;  %v471_v37 = vmax.f32 %v463_v31, 0.0 }
 0x123   :  { %v425_v30 = vpop.f32.mrf.mxu0 }
 0x124   :  { %v467_v32 = vadd.f32 %v466_v26, %v424_v29  ;;  %v426_v33 = vadd.f32 %v425_v30, %v109_v20  ;;  %v473_v35 = vmax.f32 %v465_v28, 0.0 }
 0x126   :  { %v469_v36 = vadd.f32 %v468_v34, %v426_v33  ;;  %v472_v38 = vmax.f32 %v467_v32, 0.0  ;;  %v475_v40 = vmax.f32 %v471_v37, %v473_v35 }
 0x128   :  { %v474_v39 = vmax.f32 %v469_v36, 0.0 }
 0x12a   :  { %v476_v41 = vmax.f32 %v472_v38, %v474_v39 }
 0x12c   :  { %v477_v42 = vpack.c.bf16 %v476_v41, %v475_v40 }
 0x12e   :  { %607 = vmatmul.mubr.bf16.vlgmr.msra.gmra.mxu1 %v477_v42 }
 0x12f   :  { %986 = vmatprep.mubr.msk.bf16.mxu1 %vm1172_vm1, %v1171_v8  ;;  %971 = vmatpush3.bf16.msra.mxu1 %v1112_v46 }
 0x130   :  { %972 = vmatprep.subr.bf16.mxu1 %v1171_v8 }
 0x133   :  { %973 = vmatpush3.bf16.msra.mxu1 %v1113_v47 }
 0x134   :  { %974 = vmatprep.subr.bf16.mxu1 %v1171_v8 }
 0x137   :  { %975 = vmatpush3.bf16.msra.mxu1 %v1114_v48 }
 0x138   :  { %976 = vmatprep.subr.bf16.mxu1 %v1171_v8 }
 0x13b   :  { %977 = vmatpush3.bf16.msra.mxu1 %v1115_v49 }
 0x13c   :  { %978 = vmatprep.subr.bf16.mxu1 %v1171_v8 }
 0x13f   :  { %979 = vmatpush3.bf16.msra.mxu1 %v1116_v50 }
 0x140   :  { %980 = vmatprep.subr.bf16.mxu1 %v1171_v8 }
 0x143   :  { %981 = vmatpush3.bf16.msra.mxu1 %v1117_v51 }
 0x144   :  { %982 = vmatprep.subr.bf16.mxu1 %v1171_v8 }
 0x147   :  { %983 = vmatpush3.bf16.msra.mxu1 %v1118_v63 }
 0x148   :  { %984 = vmatprep.subr.bf16.mxu1 %v1171_v8 }
 0x14b   :  { %985 = vmatpush3.bf16.msra.mxu1 %v1119_v0 }
 0x1ee   :  { %v608_v52 = vpop.f32.mrf.mxu1 }
 0x1ef   :  { %v617_v57 = vmax.f32 %v608_v52, 0.0 }
 0x1f0   :  { %v610_v53 = vpop.f32.mrf.mxu1 }
 0x1f1   :  { %v619_v55 = vmax.f32 %v610_v53, 0.0 }
 0x1f2   :  { %v612_v54 = vpop.f32.mrf.mxu1 }
 0x1f3   :  { %v618_v58 = vmax.f32 %v612_v54, 0.0  ;;  %v621_v60 = vmax.f32 %v617_v57, %v619_v55 }
 0x1f4   :  { %v614_v56 = vpop.f32.mrf.mxu1 }
 0x1f5   :  { %v620_v59 = vmax.f32 %v614_v56, 0.0 }
 0x1f7   :  { %v622_v61 = vmax.f32 %v618_v58, %v620_v59 }
 0x1f9   :  { %v623_v62 = vpack.c.bf16 %v622_v61, %v621_v60 }
 0x1fb   :  { %967 = vmatmul.mubr.bf16.vlgmr.msra.gmra.mxu0 %v623_v62 }
 0x2bb   :  { %v722_v1 = vpop.f32.mrf.mxu0 }
 0x2bc   :  { %v729_v4 = vmax.f32 %v722_v1, 0.0 }
 0x2bd   :  { %v968_v2 = vpop.f32.mrf.mxu0 }
 0x2bf   :  { %v725_v3 = vpop.f32.mrf.mxu0 }
 0x2c0   :  { %v730_v5 = vmax.f32 %v725_v3, 0.0 }
 0x2c1   :  { %v969_v6 = vpop.f32.mrf.mxu0 }
 0x2c2   :  { %v731_v7 = vpack.c.bf16 %v730_v5, %v729_v4 }
 0x2c4   :  { %987 = vmatmul.mubr.bf16.vlgmr.msra.gmra.mxu1 %v731_v7 }
 0x384   :  { %v830_v9 = vpop.f32.mrf.mxu1 }
 0x385   :  { %837 = vst [vmem:[%s1247_s4] sm:$0xff] %v830_v9 }
 0x386   :  { %v988_v10 = vpop.f32.mrf.mxu1 }
 0x388   :  { %v833_v11 = vpop.f32.mrf.mxu1 }
 0x389   :  { %838 = vst [vmem:[%s1247_s4 + $0x8] sm:$0xff] %v833_v11 }
 0x38a   :  { %v989_v8 = vpop.f32.mrf.mxu1 }
 0x38b   :  { %843 = vsyncpa [#allocation3], 1 }
 0x38c   :  { %844 = vsyncpa [#allocation5], 1 }

</bundles_post_ra>
